<compile_context>
chip_gen: v7x
topology: tpu7x:2x2x1
jax: 0.10.0
libtpu: 0.0.40
codegen_flags: <defaults>
</compile_context>

<pallas_src>
import math

import jax
import jax.numpy as jnp
from jax.experimental import pallas as pl
from jax.experimental.pallas import tpu as pltpu


def _prior_pz_kernel(m_ref, w_ref, b_ref, o_ref):
    # MXU contraction with f32 accumulation; bias added post-dot via implicit
    # (1, lanes) broadcast (no materialized broadcast traffic).
    acc = jnp.dot(m_ref[...], w_ref[...], preferred_element_type=jnp.float32)
    acc = acc + b_ref[...].astype(jnp.float32)
    o_ref[...] = acc.astype(o_ref.dtype)


def _round_up(x, n):
    return ((x + n - 1) // n) * n


def _sublane_granularity(dtype):
    itemsize = jnp.dtype(dtype).itemsize
    return {4: 8, 2: 16, 1: 32}.get(itemsize, 8)


def _block_diag(w, pack):
    """pack copies of w (k, n) on the diagonal -> (pack*k, pack*n)."""
    return jnp.kron(jnp.eye(pack, dtype=w.dtype), w)


def _choose_tiling(rows, sub, max_tile_rows):
    """Pick (num_tiles, tile_r): tile_r sublane-aligned, >=2 even tiles when
    the batch is large enough (v7x megacore), minimal padding otherwise."""
    nt = max(1, -(-rows // max_tile_rows))
    if rows >= 2 * sub:
        nt = max(nt, 2)                      # keep both v7x TensorCores busy
    if nt > 1 and nt % 2:
        nt += 1                              # even tile count -> no 2x tail
    tile_r = _round_up(-(-rows // nt), sub)
    return nt, tile_r


def prior_pz_forward(m, weight_t, bias, *, max_tile_rows=8192):
    """m: (B, num_classes), weight_t: (num_classes, 2*latent_dim),
    bias: (2*latent_dim,)  ->  (B, 2*latent_dim)."""
    B, K = m.shape
    out_dim = weight_t.shape[1]
    dtype = m.dtype
    itemsize = jnp.dtype(dtype).itemsize
    sub = _sublane_granularity(dtype)

    # ---- lane-dense output layout (generalized pack) ---------------------
    # pack batch rows are folded into one lane-dense output row via a
    # block-diagonal weight; lanes = pack*out_dim is an exact multiple of 128
    # so every stored lane is useful and the wrapper reshape is free.
    pack = 128 // math.gcd(out_dim, 128)
    lanes = pack * out_dim
    if lanes <= 1024 and pack * K <= 2048:
        w_eff = weight_t if pack == 1 else _block_diag(weight_t, pack)
        b_eff = bias if pack == 1 else jnp.tile(bias, pack)
    else:
        # Pathological out_dim: fall back to zero-padded lanes.
        pack = 1
        lanes = _round_up(out_dim, 128)
        w_eff = jnp.pad(weight_t, ((0, 0), (0, lanes - out_dim)))
        b_eff = jnp.pad(bias, (0, lanes - out_dim))
    k_eff = K * pack

    # ---- batch tiling -----------------------------------------------------
    # Cap tile rows by a ~12 MiB VMEM budget (double-buffered m + out tiles),
    # safe under v5e's 16 MiB scoped default (v6e/v7x: 32 MiB).
    per_row_bytes = 2 * (k_eff + lanes) * itemsize
    vmem_cap_rows = max(sub, (12 * 1024 * 1024 // per_row_bytes) // sub * sub)
    max_tile_rows = min(max_tile_rows, vmem_cap_rows)

    rows = -(-B // pack)                      # logical slab rows (ceil)
    num_tiles, tile_r = _choose_tiling(rows, sub, max_tile_rows)
    rows_p = tile_r * num_tiles
    b_padded = rows_p * pack

    # Skip the pad copy when the batch already tiles exactly (HBM win).
    if b_padded == B:
        m_slab = m.reshape(rows_p, k_eff)
    else:
        m_slab = jnp.pad(m, ((0, b_padded - B), (0, 0))).reshape(rows_p, k_eff)
    w_eff = w_eff.astype(dtype)
    b2d = b_eff.reshape(1, lanes).astype(dtype)

    # Useful work only (zero blocks of the block-diagonal weight excluded).
    cost = pl.CostEstimate(
        flops=2 * B * K * out_dim,
        transcendentals=0,
        bytes_accessed=(B * K + weight_t.size + bias.size + B * out_dim)
        * itemsize,
    )

    out_slab = pl.pallas_call(
        _prior_pz_kernel,
        out_shape=jax.ShapeDtypeStruct((rows_p, lanes), dtype),
        grid=(num_tiles,),
        in_specs=[
            pl.BlockSpec((tile_r, k_eff), lambda i: (i, 0)),   # streamed m
            pl.BlockSpec((k_eff, lanes), lambda i: (0, 0)),    # resident W
            pl.BlockSpec((1, lanes), lambda i: (0, 0)),        # resident bias
        ],
        out_specs=pl.BlockSpec((tile_r, lanes), lambda i: (i, 0)),
        compiler_params=pltpu.CompilerParams(
            dimension_semantics=("parallel",),
        ),
        cost_estimate=cost,
    )(m_slab, w_eff, b2d)

    # Un-pack / un-pad (free reshape; slice only when padding was needed).
    if pack == 1:
        if lanes == out_dim and rows_p == B:
            return out_slab
        return out_slab[:B, :out_dim]
    out = out_slab.reshape(b_padded, out_dim)
    return out if b_padded == B else out[:B]


def init_prior_pz_params(key, num_classes, latent_dim, dtype=jnp.float32):
    """Deterministic init mimicking nn.Linear's default (uniform in
    [-1/sqrt(fan_in), 1/sqrt(fan_in)])."""
    out_dim = 2 * latent_dim
    k_w, k_b = jax.random.split(key)
    bound = 1.0 / jnp.sqrt(jnp.asarray(num_classes, dtype))
    # PyTorch weight is (out_dim, num_classes); store transposed for the kernel.
    w_pt = jax.random.uniform(k_w, (out_dim, num_classes), dtype,
                              minval=-bound, maxval=bound)
    b = jax.random.uniform(k_b, (out_dim,), dtype, minval=-bound, maxval=bound)
    return w_pt.T, b


if __name__ == "__main__":
    key = jax.random.PRNGKey(0)
    num_classes = 4
    latent_dim = 16
    batch = 8

    k_params, k_in, k_big = jax.random.split(key, 3)
    weight_t, bias = init_prior_pz_params(k_params, num_classes, latent_dim)

    # Small shape consistent with the module: m = soft class assignments.
    m = jax.random.uniform(k_in, (batch, num_classes), jnp.float32)
    out = prior_pz_forward(m, weight_t, bias)
    jax.block_until_ready(out)
    ref = m @ weight_t + bias[None, :]
    assert out.shape == (batch, 2 * latent_dim)
    assert jnp.allclose(out, ref, atol=1e-5, rtol=1e-5)

    # Larger batch exercising the multi-tile grid + ragged-tail padding path.
    m_big = jax.random.uniform(k_big, (5000, num_classes), jnp.float32)
    out_big = prior_pz_forward(m_big, weight_t, bias)
    jax.block_until_ready(out_big)
    ref_big = m_big @ weight_t + bias[None, :]
    assert out_big.shape == (5000, 2 * latent_dim)
    assert jnp.allclose(out_big, ref_big, atol=1e-5, rtol=1e-5)

    # Exact-tiling batch (no wrapper pad / slice copies on the hot path).
    m_exact = jax.random.uniform(k_big, (4096, num_classes), jnp.float32)
    out_exact = prior_pz_forward(m_exact, weight_t, bias)
    jax.block_until_ready(out_exact)
    ref_exact = m_exact @ weight_t + bias[None, :]
    assert jnp.allclose(out_exact, ref_exact, atol=1e-5, rtol=1e-5)

    print("KERNEL_OK")
</pallas_src>

<mosaic_0001>
module attributes {stable_mosaic.version = 11 : i64} {
  func.func @_prior_pz_kernel(%arg0: i32, %arg1: memref<8x16xf32, #tpu.memory_space<vmem>>, %arg2: memref<16x128xf32, #tpu.memory_space<vmem>>, %arg3: memref<1x128xf32, #tpu.memory_space<vmem>>, %arg4: memref<8x128xf32, #tpu.memory_space<vmem>>) attributes {dimension_semantics = [#tpu.dimension_semantics<parallel>], iteration_bounds = array<i64: 1>, scalar_prefetch = 0 : i64, scratch_operands = 0 : i64, tpu.core_type = #tpu.core_type<tc>, window_params = [{transform_indices = @transform_0, window_bounds = array<i64: 8, 16>}, {pipeline_mode = #tpu.pipeline_mode<synchronous>, transform_indices = @transform_1, window_bounds = array<i64: 16, 128>}, {pipeline_mode = #tpu.pipeline_mode<synchronous>, transform_indices = @transform_2, window_bounds = array<i64: 1, 128>}, {transform_indices = @transform_3, window_bounds = array<i64: 8, 128>}]} {
    %c0 = arith.constant 0 : index
    %c0_0 = arith.constant 0 : index
    %0 = vector.load %arg1[%c0, %c0_0] : memref<8x16xf32, #tpu.memory_space<vmem>>, vector<8x16xf32>
    %c0_1 = arith.constant 0 : index
    %c0_2 = arith.constant 0 : index
    %1 = vector.load %arg2[%c0_1, %c0_2] : memref<16x128xf32, #tpu.memory_space<vmem>>, vector<16x128xf32>
    %cst = arith.constant dense<0.000000e+00> : vector<8x128xf32>
    %2 = tpu.matmul %0, %1, %cst {dimension_numbers = #tpu.dot_dimension_numbers<[1], [0], [0], [1], [0, 0, 1, 1], [], []>} : vector<8x16xf32>, vector<16x128xf32>, vector<8x128xf32> -> vector<8x128xf32>
    %c0_3 = arith.constant 0 : index
    %c0_4 = arith.constant 0 : index
    %3 = vector.load %arg3[%c0_3, %c0_4] : memref<1x128xf32, #tpu.memory_space<vmem>>, vector<1x128xf32>
    %4 = vector.broadcast %3 : vector<1x128xf32> to vector<8x128xf32>
    %5 = arith.addf %2, %4 : vector<8x128xf32>
    %c0_5 = arith.constant 0 : index
    %c0_6 = arith.constant 0 : index
    %6 = vector.load %arg4[%c0_5, %c0_6] : memref<8x128xf32, #tpu.memory_space<vmem>>, vector<8x128xf32>
    tpu.vector_store %arg4[%c0_5, %c0_6], %5 {strides = array<i32>} : memref<8x128xf32, #tpu.memory_space<vmem>>, vector<8x128xf32>,
    return
  }
  func.func @transform_0(%arg0: i32) -> (i32, i32) {
    %c0_i32 = arith.constant 0 : i32
    %c0_i32_0 = arith.constant 0 : i32
    return %arg0, %c0_i32 : i32, i32
  }
  func.func @transform_1(%arg0: i32) -> (i32, i32) {
    %c0_i32 = arith.constant 0 : i32
    %c0_i32_0 = arith.constant 0 : i32
    %c0_i32_1 = arith.constant 0 : i32
    return %c0_i32, %c0_i32_0 : i32, i32
  }
  func.func @transform_2(%arg0: i32) -> (i32, i32) {
    %c0_i32 = arith.constant 0 : i32
    %c0_i32_0 = arith.constant 0 : i32
    %c0_i32_1 = arith.constant 0 : i32
    return %c0_i32, %c0_i32_0 : i32, i32
  }
  func.func @transform_3(%arg0: i32) -> (i32, i32) {
    %c0_i32 = arith.constant 0 : i32
    %c0_i32_0 = arith.constant 0 : i32
    return %arg0, %c0_i32 : i32, i32
  }
}

</mosaic_0001>

<bundles_post_ra>
// kernel: tpu_custom_call.1
= control target key start
LH: loop header
LB: loop body
LE: loop exit
PB: predicated region body
PF: predicated region fallthrough
CT: control target
= control target key end

     0   :  { %8 = vsyncpa [#allocation3], 0  ;;  %s311_s0 = inlined_call_operand.hbm [shape: f32[8,16], index: 0, kind: input, shape index: {}]   ;;  %s312_s1 = inlined_call_operand.hbm [shape: f32[16,128], index: 1, kind: input, shape index: {}]   ;;  %s313_s2 = inlined_call_operand.vmem [shape: f32[1,128], index: 2, kind: input, shape index: {}]   ;;  %s314_s3 = inlined_call_operand.hbm [shape: f32[8,128], index: 3, kind: output, shape index: {}]  }
   0x1   :  { %9 = vsyncpa [#allocation6], 0 }
   0x2   :  { %10 = vsyncpa [#allocation4], 0  ;;  %s237_s12 = smov [#allocation2]   ;;  %s238_s14 = smov [#allocation5]  }
   0x3   :  { %s17_s13 = sshll.u32 %s237_s12, 4  ;;  %s26_s15 = sshll.u32 %s238_s14, 4  ;;  %s18_s13 = int_to_ptr.vmem [resolvable:$true] %s17_s13  ;;  %s265_s15 = int_to_ptr.vmem [resolvable:$true] %s26_s15 }
   0x4   :  { %s165_s18 = scalar_lea.hbm %s311_s0, 128 }
   0x5   :  { %p166_p0 = scmp.ne.s32.totalorder %s311_s0, %s165_s18  ;;  %p169_p1 = scmp.lt.u32.totalorder %s165_s18, %s311_s0 }
   0x7   :  { %p171_p2 = pnand %p169_p1, %p166_p0 }
   0x9   :  { %174 = shalt.err (!%p171_p2)
}
   0xa   :  { %s175_s23 = scalar_lea.vmem %s18_s13, 128  ;;  %p180_p4 = scmp.lt.s32.totalorder %s18_s13, %s18_s13 }
   0xb   :  { %p176_p3 = scmp.ne.s32.totalorder %s18_s13, %s175_s23  ;;  %p181_p5 = scmp.lt.s32.totalorder %s175_s23, %s175_s23 }
   0xd   :  { %p182_p6 = por %p181_p5, %p180_p4 }
   0xf   :  { %p183_p7 = pnand %p182_p6, %p176_p3 }
  0x11   :  { %186 = shalt.err (!%p183_p7)
}
  0x12   :  { %20 = dma.hbm_to_vmem [thread:$0]  %s311_s0, 128, %s18_s13, [#allocation3]  }
  0x13   :  { %s187_s28 = scalar_lea.hbm %s312_s1, 256 }
  0x14   :  { %p188_p8 = scmp.ne.s32.totalorder %s312_s1, %s187_s28  ;;  %p191_p9 = scmp.lt.u32.totalorder %s187_s28, %s312_s1 }
  0x16   :  { %p193_p10 = pnand %p191_p9, %p188_p8 }
  0x18   :  { %196 = shalt.err (!%p193_p10)
}
  0x19   :  { %s197_s6 = scalar_lea.vmem %s265_s15, 256  ;;  %p202_p12 = scmp.lt.s32.totalorder %s265_s15, %s265_s15 }
  0x1a   :  { %p198_p11 = scmp.ne.s32.totalorder %s265_s15, %s197_s6  ;;  %p203_p13 = scmp.lt.s32.totalorder %s197_s6, %s197_s6 }
  0x1c   :  { %p204_p0 = por %p203_p13, %p202_p12 }
  0x1e   :  { %p205_p1 = pnand %p204_p0, %p198_p11 }
  0x20   :  { %208 = shalt.err (!%p205_p1)
}
  0x21   :  { %s239_s0 = smov 128   ;;  %s240_s7 = smov 8  }
  0x22   :  { %32 = dma.hbm_to_vmem [thread:$0]  %s312_s1, 256, %s265_s15, [#allocation6], %s239_s0, %s239_s0, %s240_s7  }
  0x23   :  { %231 = dma.done.wait [#allocation3], 128  }
  0x24   :  { %232 = vsyncadd [#allocation3], 4294967168 }
  0x25   :  { %233 = dma.done.wait [#allocation6], 256  }
  0x26   :  { %234 = vsyncadd [#allocation6], 4294967040  ;;  %v241_v0 = vmov 0.0|0.0   ;;  %vm242_vm0 = vmmov 0   ;;  %v243_v1 = vmov 0.0   ;;  %v42_v2 = vld [vmem:[#allocation5] sm:$0xff] }
  0x27   :  { %154 = vmatprep.subr.bf16.mxu0 %v241_v0  ;;  %151 = vmatprep.mubr.msk.f32.mxu0 %vm242_vm0, %v243_v1  ;;  %v43_v3 = vld [vmem:[#allocation5 + $0x8] sm:$0xff]  ;;  %v41_v5 = vld [vmem:[#allocation2] sm:$0xff]  ;;  %vm51_vm1 = vcmask 130048   ;;  %s244_s1 = smov [#allocation7]  }
  0x28   :  { %v155_v4 = vpack.c.bf16 %v43_v3, %v42_v2  ;;  %v142_v6 = vld [vmem:[%s313_s2] ss:$0 sm:$0xff]  ;;  %s132_s12 = sshll.u32 %s244_s1, 4  ;;  %s133_s12 = int_to_ptr.vmem [resolvable:$true] %s132_s12 }
  0x29   :  { %s209_s13 = scalar_lea.vmem %s133_s12, 128  ;;  %p214_p3 = scmp.lt.s32.totalorder %s133_s12, %s133_s12 }
  0x2a   :  { %156 = vmatpush3.bf16.msra.mxu0 %v155_v4  ;;  %p210_p2 = scmp.ne.s32.totalorder %s133_s12, %s209_s13  ;;  %p215_p4 = scmp.lt.s32.totalorder %s209_s13, %s209_s13 }
  0x2c   :  { %p216_p5 = por %p215_p4, %p214_p3 }
  0x2d   :  { %152 = vmatmul.mubr.msk.f32.vlgmr.msra.gmra.mrb[0].mxu0 %vm51_vm1, %v41_v5 }
  0x2e   :  { %p217_p6 = pnand %p216_p5, %p210_p2 }
 0x100   :  { %v121_v7 = vpop.f32.mrb[0].mxu0 }
 0x101   :  { %v122_v8 = vadd.f32 %v142_v6, %v121_v7  ;;  %v153_v9 = vpop.f32.mrb[1].mxu0 }
 0x103   :  { %125 = vst [vmem:[#allocation7] sm:$0xff] %v122_v8 }
 0x104   :  { %220 = shalt.err (!%p217_p6)
}
 0x105   :  { %s221_s16 = scalar_lea.hbm %s314_s3, 128 }
 0x106   :  { %p222_p7 = scmp.ne.s32.totalorder %s314_s3, %s221_s16  ;;  %p225_p8 = scmp.lt.u32.totalorder %s221_s16, %s314_s3 }
 0x108   :  { %p227_p9 = pnand %p225_p8, %p222_p7 }
 0x10a   :  { %230 = shalt.err (!%p227_p9)
}
 0x10b   :  { %135 = dma.vmem_to_hbm [thread:$0]  %s133_s12, 128, %s314_s3, [#allocation4]  }
 0x10c   :  { %235 = dma.done.wait [#allocation4], 128  }
 0x10d   :  { %236 = vsyncadd [#allocation4], 4294967168 }
 0x10e   :  { %139 = vsyncpa [#allocation3], 1 }
 0x10f   :  { %140 = vsyncpa [#allocation6], 1 }
 0x110   :  { %141 = vsyncpa [#allocation4], 1 }

</bundles_post_ra>
